<compile_context>
chip_gen: v6e
topology: v6e:2x2x1
jax: 0.10.0
libtpu: 0.0.40
codegen_flags: <defaults>
</compile_context>

<pallas_src>
import functools
import math

import jax
import jax.numpy as jnp
from jax.experimental import pallas as pl
from jax.experimental.pallas import tpu as pltpu

LANE = 128  # TPU lane width; all feature dims are pre-padded to this host-side.


def cnn1d_kernel(hidden_dim, max_p_norm, x_ref, vec_ref, w_ref, out_ref):
    """Whole CNN1D forward in one invocation (everything fits comfortably in VMEM).

    x_ref   : (B, 2)      raw (a, b) integer operands as f32
    vec_ref : (16, 128)   packed bias/affine row vectors (see pack_params)
    w_ref   : (512, 128)  packed weight matrices       (see pack_params)
    out_ref : (B, 128)    logits; real values live in lanes [0, max_p_out)
    """
    inv_p = 1.0 / max_p_norm
    x = x_ref[...]
    a = x[:, 0:1] * inv_p                    # (B, 1)
    b = x[:, 1:2] * inv_p                    # (B, 1)

    vec = vec_ref[...]
    wp, bp = vec[0:1, :], vec[1:2, :]        # input_proj Linear(1, P) (padded lanes = 0)
    bc = vec[2:3, :]                         # Conv1d bias
    bng, bnb = vec[3:4, :], vec[4:5, :]      # BatchNorm1d affine
    bf1 = vec[5:6, :]                        # fc_layers[0] bias
    lng, lnb = vec[6:7, :], vec[7:8, :]      # LayerNorm affine
    bf2 = vec[8:9, :]                        # fc_layers[3] bias

    # input_proj (in_features=1) as a VPU broadcast + ReLU. Padded lanes stay exactly 0.
    proj_a = jnp.maximum(a * wp + bp, 0.0)   # (B, 128)
    proj_b = jnp.maximum(b * wp + bp, 0.0)   # (B, 128)

    # Conv1d(P, F, kernel_size=2) over the length-2 sequence == one fused matmul.
    proj = jnp.concatenate([proj_a, proj_b], axis=-1)              # (B, 256)
    wc = w_ref[0:2 * LANE, :]                                      # (256, 128)
    conv = jnp.dot(proj, wc, preferred_element_type=jnp.float32) + bc
    conv = jnp.maximum(conv, 0.0)                                  # ReLU; pads stay 0

    # BatchNorm1d, training mode: batch statistics, biased variance, eps=1e-5.
    mean = jnp.mean(conv, axis=0, keepdims=True)
    var = jnp.mean((conv - mean) ** 2, axis=0, keepdims=True)
    bn = (conv - mean) * jax.lax.rsqrt(var + 1e-5) * bng + bnb     # pads: 0

    # fc_layers[0] + ReLU
    wf1 = w_ref[2 * LANE:3 * LANE, :]                              # (128, 128)
    h = jnp.maximum(jnp.dot(bn, wf1, preferred_element_type=jnp.float32) + bf1, 0.0)

    # LayerNorm over the real hidden_dim lanes only (pad lanes are exactly 0, so the
    # sum over 128 lanes divided by hidden_dim is the true mean; variance is masked).
    inv_h = 1.0 / float(hidden_dim)
    lane = jax.lax.broadcasted_iota(jnp.int32, h.shape, dimension=1)
    mu = jnp.sum(h, axis=-1, keepdims=True) * inv_h
    d = jnp.where(lane < hidden_dim, h - mu, 0.0)
    v = jnp.sum(d * d, axis=-1, keepdims=True) * inv_h
    hn = d * jax.lax.rsqrt(v + 1e-5) * lng + lnb                   # pads: 0

    # fc_layers[3]
    wf2 = w_ref[3 * LANE:4 * LANE, :]                              # (128, 128)
    out_ref[...] = jnp.dot(hn, wf2, preferred_element_type=jnp.float32) + bf2


def cnn1d_forward(x, packed, max_p_out, hidden_dim):
    B = x.shape[0]
    kernel = functools.partial(cnn1d_kernel, hidden_dim, float(max_p_out))
    vmem = pl.BlockSpec(memory_space=pltpu.MemorySpace.VMEM)
    out_padded = pl.pallas_call(
        kernel,
        out_shape=jax.ShapeDtypeStruct((B, LANE), jnp.float32),
        in_specs=[vmem, vmem, vmem],
        out_specs=vmem,
    )(x.astype(jnp.float32), packed["vec"], packed["w"])
    return out_padded[:, :max_p_out]


def init_raw_params(key, max_p_out, input_proj_dim, hidden_dim, num_filters, kernel_size=2):
    """Deterministic PyTorch-style (uniform +-1/sqrt(fan_in)) parameter init, logical shapes."""
    P, F, H, O = input_proj_dim, num_filters, hidden_dim, max_p_out
    keys = jax.random.split(key, 8)

    def u(k, shape, fan_in):
        bound = 1.0 / math.sqrt(fan_in)
        return jax.random.uniform(k, shape, jnp.float32, -bound, bound)

    wp = u(keys[0], (1, P), 1)                 # Linear(1, P) weight, stored transposed
    bp = u(keys[1], (1, P), 1)
    fan_conv = P * kernel_size
    w_conv = u(keys[2], (F, P, kernel_size), fan_conv)   # Conv1d weight (F, P, 2)
    bc = u(keys[3], (1, F), fan_conv)
    bng = jnp.ones((1, F), jnp.float32)
    bnb = jnp.zeros((1, F), jnp.float32)
    wf1 = u(keys[4], (F, H), F)
    bf1 = u(keys[5], (1, H), F)
    lng = jnp.ones((1, H), jnp.float32)
    lnb = jnp.zeros((1, H), jnp.float32)
    wf2 = u(keys[6], (H, O), H)
    bf2 = u(keys[7], (1, O), H)
    return dict(wp=wp, bp=bp, w_conv=w_conv, bc=bc, bng=bng, bnb=bnb,
                wf1=wf1, bf1=bf1, lng=lng, lnb=lnb, wf2=wf2, bf2=bf2)


def pack_params(raw, P, F, H, O):
    """Pack all params into two lane-dense, zero-padded slabs (3 DMAs total with x)."""
    assert max(P, F, H, O) <= LANE, "packing assumes every feature dim <= 128"

    vec = jnp.zeros((16, LANE), jnp.float32)
    vec = vec.at[0, :P].set(raw["wp"].reshape(P))
    vec = vec.at[1, :P].set(raw["bp"].reshape(P))
    vec = vec.at[2, :F].set(raw["bc"].reshape(F))
    vec = vec.at[3, :F].set(raw["bng"].reshape(F))
    vec = vec.at[4, :F].set(raw["bnb"].reshape(F))
    vec = vec.at[5, :H].set(raw["bf1"].reshape(H))
    vec = vec.at[6, :H].set(raw["lng"].reshape(H))
    vec = vec.at[7, :H].set(raw["lnb"].reshape(H))
    vec = vec.at[8, :O].set(raw["bf2"].reshape(O))

    w0 = raw["w_conv"][:, :, 0].T              # (P, F) conv tap 0
    w1 = raw["w_conv"][:, :, 1].T              # (P, F) conv tap 1
    w = jnp.zeros((4 * LANE, LANE), jnp.float32)
    w = w.at[0:P, 0:F].set(w0)                           # rows [0, 128): tap 0
    w = w.at[LANE:LANE + P, 0:F].set(w1)                 # rows [128, 256): tap 1
    w = w.at[2 * LANE:2 * LANE + F, 0:H].set(raw["wf1"])  # rows [256, 384): fc1
    w = w.at[3 * LANE:3 * LANE + H, 0:O].set(raw["wf2"])  # rows [384, 512): fc2
    return {"vec": vec, "w": w}


def cnn1d_reference(x, p, max_p_norm):
    """Pure-JAX reference matching the PyTorch forward (train-mode BatchNorm)."""
    hi = jax.lax.Precision.HIGHEST
    inv_p = 1.0 / max_p_norm
    a = x[:, 0:1] * inv_p
    b = x[:, 1:2] * inv_p
    proj_a = jnp.maximum(jnp.dot(a, p["wp"], precision=hi) + p["bp"], 0.0)
    proj_b = jnp.maximum(jnp.dot(b, p["wp"], precision=hi) + p["bp"], 0.0)
    w0 = p["w_conv"][:, :, 0].T
    w1 = p["w_conv"][:, :, 1].T
    conv = jnp.maximum(jnp.dot(proj_a, w0, precision=hi)
                       + jnp.dot(proj_b, w1, precision=hi) + p["bc"], 0.0)
    mean = jnp.mean(conv, axis=0, keepdims=True)
    var = jnp.mean((conv - mean) ** 2, axis=0, keepdims=True)
    bn = (conv - mean) * jax.lax.rsqrt(var + 1e-5) * p["bng"] + p["bnb"]
    h = jnp.maximum(jnp.dot(bn, p["wf1"], precision=hi) + p["bf1"], 0.0)
    mu = jnp.mean(h, axis=-1, keepdims=True)
    v = jnp.mean((h - mu) ** 2, axis=-1, keepdims=True)
    hn = (h - mu) * jax.lax.rsqrt(v + 1e-5) * p["lng"] + p["lnb"]
    return jnp.dot(hn, p["wf2"], precision=hi) + p["bf2"]


if __name__ == "__main__":
    max_p_out = 32
    input_proj_dim = 16
    hidden_dim = 32
    num_filters = 64
    B = 8

    key = jax.random.PRNGKey(0)
    kx, kp = jax.random.split(key)
    # x holds the two integer operands (a, b) of the modular-arithmetic task.
    x = jax.random.randint(kx, (B, 2), 0, max_p_out)
    raw = init_raw_params(kp, max_p_out, input_proj_dim, hidden_dim, num_filters)
    packed = pack_params(raw, input_proj_dim, num_filters, hidden_dim, max_p_out)

    out = cnn1d_forward(x, packed, max_p_out, hidden_dim)
    out = jax.block_until_ready(out)

    assert out.shape == (B, max_p_out), out.shape
    assert bool(jnp.all(jnp.isfinite(out)))

    ref = cnn1d_reference(x.astype(jnp.float32), raw, float(max_p_out))
    max_err = float(jnp.max(jnp.abs(out - ref)))
    assert bool(jnp.allclose(out, ref, atol=2e-3, rtol=2e-3)), max_err

    print("KERNEL_OK")
</pallas_src>

<mosaic_0001>
module attributes {stable_mosaic.version = 11 : i64} {
  func.func @cnn1d_kernel(%arg0: memref<8x2xf32, #tpu.memory_space<vmem>>, %arg1: memref<16x128xf32, #tpu.memory_space<vmem>>, %arg2: memref<512x128xf32, #tpu.memory_space<vmem>>, %arg3: memref<8x128xf32, #tpu.memory_space<vmem>>) attributes {dimension_semantics = [], scalar_prefetch = 0 : i64, scratch_operands = 0 : i64, tpu.core_type = #tpu.core_type<tc>} {
    %c0 = arith.constant 0 : index
    %c0_0 = arith.constant 0 : index
    %0 = vector.load %arg0[%c0, %c0_0] : memref<8x2xf32, #tpu.memory_space<vmem>>, vector<8x2xf32>
    %1 = vector.extract_strided_slice %0 {offsets = [0, 0], sizes = [8, 1], strides = [1, 1]} : vector<8x2xf32> to vector<8x1xf32>
    %cst = arith.constant 3.125000e-02 : f32
    %2 = vector.broadcast %cst : f32 to vector<8x1xf32>
    %3 = arith.mulf %1, %2 : vector<8x1xf32>
    %4 = vector.extract_strided_slice %0 {offsets = [0, 1], sizes = [8, 1], strides = [1, 1]} : vector<8x2xf32> to vector<8x1xf32>
    %cst_1 = arith.constant 3.125000e-02 : f32
    %5 = vector.broadcast %cst_1 : f32 to vector<8x1xf32>
    %6 = arith.mulf %4, %5 : vector<8x1xf32>
    %c0_2 = arith.constant 0 : index
    %c0_3 = arith.constant 0 : index
    %7 = vector.load %arg1[%c0_2, %c0_3] : memref<16x128xf32, #tpu.memory_space<vmem>>, vector<16x128xf32>
    %8 = vector.extract_strided_slice %7 {offsets = [0, 0], sizes = [1, 128], strides = [1, 1]} : vector<16x128xf32> to vector<1x128xf32>
    %9 = vector.extract_strided_slice %7 {offsets = [1, 0], sizes = [1, 128], strides = [1, 1]} : vector<16x128xf32> to vector<1x128xf32>
    %10 = vector.extract_strided_slice %7 {offsets = [2, 0], sizes = [1, 128], strides = [1, 1]} : vector<16x128xf32> to vector<1x128xf32>
    %11 = vector.extract_strided_slice %7 {offsets = [3, 0], sizes = [1, 128], strides = [1, 1]} : vector<16x128xf32> to vector<1x128xf32>
    %12 = vector.extract_strided_slice %7 {offsets = [4, 0], sizes = [1, 128], strides = [1, 1]} : vector<16x128xf32> to vector<1x128xf32>
    %13 = vector.extract_strided_slice %7 {offsets = [5, 0], sizes = [1, 128], strides = [1, 1]} : vector<16x128xf32> to vector<1x128xf32>
    %14 = vector.extract_strided_slice %7 {offsets = [6, 0], sizes = [1, 128], strides = [1, 1]} : vector<16x128xf32> to vector<1x128xf32>
    %15 = vector.extract_strided_slice %7 {offsets = [7, 0], sizes = [1, 128], strides = [1, 1]} : vector<16x128xf32> to vector<1x128xf32>
    %16 = vector.extract_strided_slice %7 {offsets = [8, 0], sizes = [1, 128], strides = [1, 1]} : vector<16x128xf32> to vector<1x128xf32>
    %17 = vector.broadcast %3 : vector<8x1xf32> to vector<8x128xf32>
    %18 = vector.broadcast %8 : vector<1x128xf32> to vector<8x128xf32>
    %19 = arith.mulf %17, %18 : vector<8x128xf32>
    %20 = vector.broadcast %9 : vector<1x128xf32> to vector<8x128xf32>
    %21 = arith.addf %19, %20 : vector<8x128xf32>
    %cst_4 = arith.constant 0.000000e+00 : f32
    %22 = vector.broadcast %cst_4 : f32 to vector<8x128xf32>
    %23 = arith.maximumf %21, %22 : vector<8x128xf32>
    %24 = vector.broadcast %6 : vector<8x1xf32> to vector<8x128xf32>
    %25 = vector.broadcast %8 : vector<1x128xf32> to vector<8x128xf32>
    %26 = arith.mulf %24, %25 : vector<8x128xf32>
    %27 = vector.broadcast %9 : vector<1x128xf32> to vector<8x128xf32>
    %28 = arith.addf %26, %27 : vector<8x128xf32>
    %cst_5 = arith.constant 0.000000e+00 : f32
    %29 = vector.broadcast %cst_5 : f32 to vector<8x128xf32>
    %30 = arith.maximumf %28, %29 : vector<8x128xf32>
    %31 = tpu.concatenate %23, %30 in 1 : vector<8x128xf32>, vector<8x128xf32> -> vector<8x256xf32>
    %c0_6 = arith.constant 0 : index
    %c0_7 = arith.constant 0 : index
    %32 = vector.load %arg2[%c0_6, %c0_7] : memref<512x128xf32, #tpu.memory_space<vmem>>, vector<256x128xf32>
    %cst_8 = arith.constant dense<0.000000e+00> : vector<8x128xf32>
    %33 = tpu.matmul %31, %32, %cst_8 {dimension_numbers = #tpu.dot_dimension_numbers<[1], [0], [0], [1], [0, 0, 1, 1], [], []>} : vector<8x256xf32>, vector<256x128xf32>, vector<8x128xf32> -> vector<8x128xf32>
    %34 = vector.broadcast %10 : vector<1x128xf32> to vector<8x128xf32>
    %35 = arith.addf %33, %34 : vector<8x128xf32>
    %cst_9 = arith.constant 0.000000e+00 : f32
    %36 = vector.broadcast %cst_9 : f32 to vector<8x128xf32>
    %37 = arith.maximumf %35, %36 : vector<8x128xf32>
    %cst_10 = arith.constant dense<0.000000e+00> : vector<128xf32>
    %38 = vector.multi_reduction <add>, %37, %cst_10 [0] : vector<8x128xf32> to vector<128xf32>
    %39 = vector.shape_cast %38 : vector<128xf32> to vector<1x128xf32>
    %cst_11 = arith.constant 8.000000e+00 : f32
    %40 = vector.broadcast %cst_11 : f32 to vector<1x128xf32>
    %41 = arith.divf %39, %40 : vector<1x128xf32>
    %42 = vector.broadcast %41 : vector<1x128xf32> to vector<8x128xf32>
    %43 = arith.subf %37, %42 : vector<8x128xf32>
    %44 = arith.mulf %43, %43 : vector<8x128xf32>
    %cst_12 = arith.constant dense<0.000000e+00> : vector<128xf32>
    %45 = vector.multi_reduction <add>, %44, %cst_12 [0] : vector<8x128xf32> to vector<128xf32>
    %46 = vector.shape_cast %45 : vector<128xf32> to vector<1x128xf32>
    %cst_13 = arith.constant 8.000000e+00 : f32
    %47 = vector.broadcast %cst_13 : f32 to vector<1x128xf32>
    %48 = arith.divf %46, %47 : vector<1x128xf32>
    %49 = vector.broadcast %41 : vector<1x128xf32> to vector<8x128xf32>
    %50 = arith.subf %37, %49 : vector<8x128xf32>
    %cst_14 = arith.constant 9.99999974E-6 : f32
    %51 = vector.broadcast %cst_14 : f32 to vector<1x128xf32>
    %52 = arith.addf %48, %51 : vector<1x128xf32>
    %53 = math.rsqrt %52 : vector<1x128xf32>
    %54 = vector.broadcast %53 : vector<1x128xf32> to vector<8x128xf32>
    %55 = arith.mulf %50, %54 : vector<8x128xf32>
    %56 = vector.broadcast %11 : vector<1x128xf32> to vector<8x128xf32>
    %57 = arith.mulf %55, %56 : vector<8x128xf32>
    %58 = vector.broadcast %12 : vector<1x128xf32> to vector<8x128xf32>
    %59 = arith.addf %57, %58 : vector<8x128xf32>
    %c256 = arith.constant 256 : index
    %c0_15 = arith.constant 0 : index
    %60 = vector.load %arg2[%c256, %c0_15] : memref<512x128xf32, #tpu.memory_space<vmem>>, vector<128x128xf32>
    %cst_16 = arith.constant dense<0.000000e+00> : vector<8x128xf32>
    %61 = tpu.matmul %59, %60, %cst_16 {dimension_numbers = #tpu.dot_dimension_numbers<[1], [0], [0], [1], [0, 0, 1, 1], [], []>} : vector<8x128xf32>, vector<128x128xf32>, vector<8x128xf32> -> vector<8x128xf32>
    %62 = vector.broadcast %13 : vector<1x128xf32> to vector<8x128xf32>
    %63 = arith.addf %61, %62 : vector<8x128xf32>
    %cst_17 = arith.constant 0.000000e+00 : f32
    %64 = vector.broadcast %cst_17 : f32 to vector<8x128xf32>
    %65 = arith.maximumf %63, %64 : vector<8x128xf32>
    %66 = tpu.iota {dimensions = array<i32: 1>} : vector<8x128xi32>
    %cst_18 = arith.constant dense<0.000000e+00> : vector<8xf32>
    %67 = vector.multi_reduction <add>, %65, %cst_18 [1] : vector<8x128xf32> to vector<8xf32>
    %68 = vector.shape_cast %67 : vector<8xf32> to vector<8x1xf32>
    %cst_19 = arith.constant 3.125000e-02 : f32
    %69 = vector.broadcast %cst_19 : f32 to vector<8x1xf32>
    %70 = arith.mulf %68, %69 : vector<8x1xf32>
    %c32_i32 = arith.constant 32 : i32
    %71 = vector.broadcast %c32_i32 : i32 to vector<8x128xi32>
    %72 = arith.cmpi slt, %66, %71 : vector<8x128xi32>
    %73 = vector.broadcast %70 : vector<8x1xf32> to vector<8x128xf32>
    %74 = arith.subf %65, %73 : vector<8x128xf32>
    %cst_20 = arith.constant 0.000000e+00 : f32
    %75 = vector.broadcast %cst_20 : f32 to vector<8x128xf32>
    %76 = arith.select %72, %74, %75 : vector<8x128xi1>, vector<8x128xf32>
    %77 = arith.mulf %76, %76 : vector<8x128xf32>
    %cst_21 = arith.constant dense<0.000000e+00> : vector<8xf32>
    %78 = vector.multi_reduction <add>, %77, %cst_21 [1] : vector<8x128xf32> to vector<8xf32>
    %79 = vector.shape_cast %78 : vector<8xf32> to vector<8x1xf32>
    %cst_22 = arith.constant 3.125000e-02 : f32
    %80 = vector.broadcast %cst_22 : f32 to vector<8x1xf32>
    %81 = arith.mulf %79, %80 : vector<8x1xf32>
    %cst_23 = arith.constant 9.99999974E-6 : f32
    %82 = vector.broadcast %cst_23 : f32 to vector<8x1xf32>
    %83 = arith.addf %81, %82 : vector<8x1xf32>
    %84 = math.rsqrt %83 : vector<8x1xf32>
    %85 = vector.broadcast %84 : vector<8x1xf32> to vector<8x128xf32>
    %86 = arith.mulf %76, %85 : vector<8x128xf32>
    %87 = vector.broadcast %14 : vector<1x128xf32> to vector<8x128xf32>
    %88 = arith.mulf %86, %87 : vector<8x128xf32>
    %89 = vector.broadcast %15 : vector<1x128xf32> to vector<8x128xf32>
    %90 = arith.addf %88, %89 : vector<8x128xf32>
    %c384 = arith.constant 384 : index
    %c0_24 = arith.constant 0 : index
    %91 = vector.load %arg2[%c384, %c0_24] : memref<512x128xf32, #tpu.memory_space<vmem>>, vector<128x128xf32>
    %cst_25 = arith.constant dense<0.000000e+00> : vector<8x128xf32>
    %92 = tpu.matmul %90, %91, %cst_25 {dimension_numbers = #tpu.dot_dimension_numbers<[1], [0], [0], [1], [0, 0, 1, 1], [], []>} : vector<8x128xf32>, vector<128x128xf32>, vector<8x128xf32> -> vector<8x128xf32>
    %93 = vector.broadcast %16 : vector<1x128xf32> to vector<8x128xf32>
    %94 = arith.addf %92, %93 : vector<8x128xf32>
    %c0_26 = arith.constant 0 : index
    %c0_27 = arith.constant 0 : index
    %95 = vector.load %arg3[%c0_26, %c0_27] : memref<8x128xf32, #tpu.memory_space<vmem>>, vector<8x128xf32>
    tpu.vector_store %arg3[%c0_26, %c0_27], %94 {strides = array<i32>} : memref<8x128xf32, #tpu.memory_space<vmem>>, vector<8x128xf32>,
    return
  }
}

</mosaic_0001>

<bundles_post_ra>
// kernel: tpu_custom_call.1
= control target key start
LH: loop header
LB: loop body
LE: loop exit
PB: predicated region body
PF: predicated region fallthrough
CT: control target
= control target key end

     0   :  { %8 = vsyncpa [#allocation3], 0  ;;  %s752_s0 = inlined_call_operand.vmem [shape: f32[8,2], index: 0, kind: input, shape index: {}]   ;;  %s753_s1 = inlined_call_operand.hbm [shape: f32[16,128], index: 1, kind: input, shape index: {}]   ;;  %s754_s2 = inlined_call_operand.hbm [shape: f32[512,128], index: 2, kind: input, shape index: {}]   ;;  %s755_s3 = inlined_call_operand.hbm [shape: f32[8,128], index: 3, kind: output, shape index: {}]  }
   0x1   :  { %9 = vsyncpa [#allocation6], 0 }
   0x2   :  { %10 = vsyncpa [#allocation4], 0  ;;  %s651_s12 = smov [#allocation2]  }
   0x3   :  { %s18_s13 = sshll.u32 %s651_s12, 4  ;;  %s19_s13 = int_to_ptr.vmem [resolvable:$true] %s18_s13 }
   0x4   :  { %s593_s14 = scalar_lea.vmem %s19_s13, 256  ;;  %p598_p1 = scmp.lt.s32.totalorder %s19_s13, %s19_s13 }
   0x5   :  { %p594_p0 = scmp.ne.s32.totalorder %s19_s13, %s593_s14  ;;  %p599_p2 = scmp.lt.s32.totalorder %s593_s14, %s593_s14 }
   0x7   :  { %p600_p3 = por %p599_p2, %p598_p1 }
   0x9   :  { %p601_p4 = pnand %p600_p3, %p594_p0 }
   0xb   :  { %604 = shalt.err (!%p601_p4)
}
   0xc   :  { %s652_s15 = smov 128   ;;  %s653_s16 = smov 8  }
   0xd   :  { %24 = dma.hbm_to_vmem [thread:$0]  %s753_s1, 256, %s19_s13, [#allocation3], %s652_s15, %s652_s15, %s653_s16  }
   0xe   :  { %s654_s19 = smov [#allocation5]  }
   0xf   :  { %s30_s20 = sshll.u32 %s654_s19, 4  ;;  %s31_s20 = int_to_ptr.vmem [resolvable:$true] %s30_s20 }
  0x10   :  { %s613_s21 = scalar_lea.vmem %s31_s20, 8192  ;;  %p618_p6 = scmp.lt.s32.totalorder %s31_s20, %s31_s20 }
  0x11   :  { %p614_p5 = scmp.ne.s32.totalorder %s31_s20, %s613_s21  ;;  %p619_p7 = scmp.lt.s32.totalorder %s613_s21, %s613_s21 }
  0x13   :  { %p620_p8 = por %p619_p7, %p618_p6 }
  0x15   :  { %p621_p9 = pnand %p620_p8, %p614_p5 }
  0x17   :  { %624 = shalt.err (!%p621_p9)
}
  0x18   :  { %36 = dma.hbm_to_vmem [thread:$0]  %s754_s2, 8192, %s31_s20, [#allocation6], %s652_s15, %s652_s15, %s653_s16  }
  0x19   :  { %645 = dma.done.wait [#allocation3], 256  }
  0x1a   :  { %646 = vsyncadd [#allocation3], 4294967040 }
  0x1b   :  { %647 = dma.done.wait [#allocation6], 8192  }
  0x1c   :  { %648 = vsyncadd [#allocation6], 4294959104  ;;  %v655_v0 = vmov 1   ;;  %v43_v1 = vld [vmem:[%s752_s0] sm:$0xff]  ;;  %v101_v2 = vld [vmem:[#allocation5 + $0xf8] sm:$0xff]  ;;  %v656_v12 = vmov 0   ;;  %v52_v36 = vlaneseq }
  0x1d   :  { %578 = vset.pattern.permute.xlu0 %v655_v0  ;;  %v85_v3 = vld [vmem:[#allocation5 + $0x78] sm:$0xff]  ;;  %v44_v4 = vmul.f32 0.03125, %v43_v1  ;;  %430 = vmatprep.subr.mxu0 %v101_v2  ;;  %v100_v5 = vld [vmem:[#allocation5 + $0xf0] sm:$0xff]  ;;  %v99_v7 = vld [vmem:[#allocation5 + $0xe8] sm:$0xff]  ;;  %v657_v51 = vmov 0.0   ;;  %vm658_vm0 = vmmov 0  }
  0x1e   :  { %v84_v6 = vld [vmem:[#allocation5 + $0x70] sm:$0xff]  ;;  %431 = vmatpush3.msra.mxu0 %v85_v3  ;;  %v83_v8 = vld [vmem:[#allocation5 + $0x68] sm:$0xff]  ;;  %v98_v9 = vld [vmem:[#allocation5 + $0xe0] sm:$0xff]  ;;  %v690_v37 = vshrl.u32 %v52_v36, 7  ;;  %499 = vmatprep.subr.mxu1 %v657_v51  ;;  %s659_s0 = smov [#allocation7]  }
  0x1f   :  { %64 = vperm.xlu0 %578, %v44_v4   ;;  %432 = vmatprep.subr.mxu0 %v100_v5  ;;  %v82_v10 = vld [vmem:[#allocation5 + $0x60] sm:$0xff]  ;;  %v97_v11 = vld [vmem:[#allocation5 + $0xd8] sm:$0xff]  ;;  %v96_v14 = vld [vmem:[#allocation5 + $0xd0] sm:$0xff]  ;;  %s420_s2 = sshll.u32 %s659_s0, 4  ;;  %s421_s2 = int_to_ptr.vmem [resolvable:$true] %s420_s2 }
  0x20   :  { %433 = vmatpush3.msra.mxu0 %v84_v6  ;;  %v81_v13 = vld [vmem:[#allocation5 + $0x58] sm:$0xff]  ;;  %v80_v15 = vld [vmem:[#allocation5 + $0x50] sm:$0xff]  ;;  %v95_v16 = vld [vmem:[#allocation5 + $0xc8] sm:$0xff]  ;;  %v54_v38 = vsub.s32 0, %v690_v37  ;;  %v59_v40 = vsub.s32 1, %v690_v37  ;;  %531 = vmatprep.mubr.msk.f32.mxu1 %vm658_vm0, %v657_v51  ;;  %s625_s25 = scalar_lea.vmem %s421_s2, 128  ;;  %p630_p11 = scmp.lt.s32.totalorder %s421_s2, %s421_s2 }
  0x21   :  { %434 = vmatprep.subr.mxu0 %v99_v7  ;;  %v79_v17 = vld [vmem:[#allocation5 + $0x48] sm:$0xff]  ;;  %v94_v18 = vld [vmem:[#allocation5 + $0xc0] sm:$0xff]  ;;  %v93_v20 = vld [vmem:[#allocation5 + $0xb8] sm:$0xff]  ;;  %p626_p10 = scmp.ne.s32.totalorder %s421_s2, %s625_s25  ;;  %p631_p12 = scmp.lt.s32.totalorder %s625_s25, %s625_s25 }
  0x22   :  { %435 = vmatpush3.msra.mxu0 %v83_v8  ;;  %v78_v19 = vld [vmem:[#allocation5 + $0x40] sm:$0xff]  ;;  %v77_v21 = vld [vmem:[#allocation5 + $0x38] sm:$0xff]  ;;  %v92_v22 = vld [vmem:[#allocation5 + $0xb0] sm:$0xff] }
  0x23   :  { %579 = vset.pattern.permute.xlu0 %v656_v12  ;;  %436 = vmatprep.subr.mxu0 %v98_v9  ;;  %v76_v23 = vld [vmem:[#allocation5 + $0x30] sm:$0xff]  ;;  %v91_v24 = vld [vmem:[#allocation5 + $0xa8] sm:$0xff]  ;;  %v90_v26 = vld [vmem:[#allocation5 + $0xa0] sm:$0xff]  ;;  %p632_p13 = por %p631_p12, %p630_p11 }
  0x24   :  { %49 = vperm.xlu0 %579, %v44_v4   ;;  %437 = vmatpush3.msra.mxu0 %v82_v10  ;;  %v75_v25 = vld [vmem:[#allocation5 + $0x28] sm:$0xff]  ;;  %v74_v27 = vld [vmem:[#allocation5 + $0x20] sm:$0xff]  ;;  %v89_v28 = vld [vmem:[#allocation5 + $0x98] sm:$0xff]  ;;  %v104_v4 = vsub.s32 2, %v690_v37 }
  0x25   :  { %438 = vmatprep.subr.mxu0 %v97_v11  ;;  %v73_v29 = vld [vmem:[#allocation5 + $0x18] sm:$0xff]  ;;  %v88_v30 = vld [vmem:[#allocation5 + $0x90] sm:$0xff]  ;;  %v87_v32 = vld [vmem:[#allocation5 + $0x88] sm:$0xff]  ;;  %p633_p0 = pnand %p632_p13, %p626_p10 }
  0x26   :  { %439 = vmatpush3.msra.mxu0 %v81_v13  ;;  %v72_v31 = vld [vmem:[#allocation5 + $0x10] sm:$0xff]  ;;  %v71_v33 = vld [vmem:[#allocation5 + $0x8] sm:$0xff]  ;;  %v86_v34 = vld [vmem:[#allocation5 + $0x80] sm:$0xff] }
  0x27   :  { %440 = vmatprep.subr.mxu0 %v96_v14  ;;  %v70_v35 = vld [vmem:[#allocation5] sm:$0xff]  ;;  %v693_v39 = vld [vmem:[#allocation2] sm:$0xff]  ;;  %v222_v52 = vld [vmem:[#allocation5 + $0x178] sm:$0xff] }
  0x28   :  { %441 = vmatpush3.msra.mxu0 %v80_v15  ;;  %580 = vset.pattern.permute.xlu0 %v655_v0  ;;  %v55_v41 = vrot.slane %v693_v39, %v54_v38  ;;  %v60_v42 = vrot.slane %v693_v39, %v59_v40  ;;  %v221_v53 = vld [vmem:[#allocation5 + $0x170] sm:$0xff]  ;;  %v220_v54 = vld [vmem:[#allocation5 + $0x168] sm:$0xff]  ;;  %v219_v55 = vld [vmem:[#allocation5 + $0x160] sm:$0xff]  ;;  %v105_v6 = vrot.slane %v693_v39, %v104_v4  ;;  %v225_v40 = vsub.s32 5, %v690_v37 }
  0x29   :  { %442 = vmatprep.subr.mxu0 %v95_v16  ;;  %500 = vmatpush3.msra.mxu1 %v222_v52  ;;  %v218_v56 = vld [vmem:[#allocation5 + $0x158] sm:$0xff]  ;;  %v217_v57 = vld [vmem:[#allocation5 + $0x150] sm:$0xff]  ;;  %v216_v58 = vld [vmem:[#allocation5 + $0x148] sm:$0xff] }
  0x2a   :  { %443 = vmatpush3.msra.mxu0 %v79_v17  ;;  %501 = vmatprep.subr.mxu1 %v657_v51  ;;  %v215_v59 = vld [vmem:[#allocation5 + $0x140] sm:$0xff]  ;;  %v214_v60 = vld [vmem:[#allocation5 + $0x138] sm:$0xff]  ;;  %v213_v61 = vld [vmem:[#allocation5 + $0x130] sm:$0xff] }
  0x2b   :  { %444 = vmatprep.subr.mxu0 %v94_v18  ;;  %502 = vmatpush3.msra.mxu1 %v221_v53  ;;  %v212_v62 = vld [vmem:[#allocation5 + $0x128] sm:$0xff]  ;;  %v211_v63 = vld [vmem:[#allocation5 + $0x120] sm:$0xff]  ;;  %v210_v0 = vld [vmem:[#allocation5 + $0x118] sm:$0xff] }
  0x2c   :  { %445 = vmatpush3.msra.mxu0 %v78_v19  ;;  %503 = vmatprep.subr.mxu1 %v657_v51  ;;  %v209_v1 = vld [vmem:[#allocation5 + $0x110] sm:$0xff]  ;;  %v208_v2 = vld [vmem:[#allocation5 + $0x108] sm:$0xff]  ;;  %v207_v3 = vld [vmem:[#allocation5 + $0x100] sm:$0xff] }
  0x2d   :  { %446 = vmatprep.subr.mxu0 %v93_v20  ;;  %504 = vmatpush3.msra.mxu1 %v220_v54 }
  0x2e   :  { %447 = vmatpush3.msra.mxu0 %v77_v21  ;;  %505 = vmatprep.subr.mxu1 %v657_v51 }
  0x2f   :  { %448 = vmatprep.subr.mxu0 %v92_v22  ;;  %506 = vmatpush3.msra.mxu1 %v219_v55 }
  0x30   :  { %449 = vmatpush3.msra.mxu0 %v76_v23  ;;  %507 = vmatprep.subr.mxu1 %v657_v51 }
  0x31   :  { %450 = vmatprep.subr.mxu0 %v91_v24  ;;  %508 = vmatpush3.msra.mxu1 %v218_v56 }
  0x32   :  { %451 = vmatpush3.msra.mxu0 %v75_v25  ;;  %509 = vmatprep.subr.mxu1 %v657_v51 }
  0x33   :  { %452 = vmatprep.subr.mxu0 %v90_v26  ;;  %510 = vmatpush3.msra.mxu1 %v217_v57  ;;  %v334_v57 = vld [vmem:[#allocation5 + $0x1d8] sm:$0xff] }
  0x34   :  { %453 = vmatpush3.msra.mxu0 %v74_v27  ;;  %511 = vmatprep.subr.mxu1 %v657_v51 }
  0x35   :  { %454 = vmatprep.subr.mxu0 %v89_v28  ;;  %512 = vmatpush3.msra.mxu1 %v216_v58  ;;  %v199_v28 = vsub.s32 3, %v690_v37  ;;  %v333_v58 = vld [vmem:[#allocation5 + $0x1d0] sm:$0xff] }
  0x36   :  { %455 = vmatpush3.msra.mxu0 %v73_v29  ;;  %513 = vmatprep.subr.mxu1 %v657_v51  ;;  %v204_v29 = vsub.s32 4, %v690_v37 }
  0x37   :  { %456 = vmatprep.subr.mxu0 %v88_v30  ;;  %514 = vmatpush3.msra.mxu1 %v215_v59  ;;  %v200_v30 = vrot.slane %v693_v39, %v199_v28  ;;  %v332_v59 = vld [vmem:[#allocation5 + $0x1c8] sm:$0xff] }
  0x38   :  { %457 = vmatpush3.msra.mxu0 %v72_v31  ;;  %515 = vmatprep.subr.mxu1 %v657_v51 }
  0x39   :  { %458 = vmatprep.subr.mxu0 %v87_v32  ;;  %516 = vmatpush3.msra.mxu1 %v214_v60  ;;  %v331_v60 = vld [vmem:[#allocation5 + $0x1c0] sm:$0xff] }
  0x3a   :  { %459 = vmatpush3.msra.mxu0 %v71_v33  ;;  %517 = vmatprep.subr.mxu1 %v657_v51  ;;  %v205_v33 = vrot.slane %v693_v39, %v204_v29 }
  0x3b   :  { %460 = vmatprep.subr.mxu0 %v86_v34  ;;  %518 = vmatpush3.msra.mxu1 %v213_v61  ;;  %v329_v61 = vld [vmem:[#allocation5 + $0x1b0] sm:$0xff] }
  0x3c   :  { %461 = vmatpush3.msra.mxu0 %v70_v35  ;;  %519 = vmatprep.subr.mxu1 %v657_v51 }
  0x3d   :  { %534 = vmatprep.subr.mxu0 %v657_v51  ;;  %520 = vmatpush3.msra.mxu1 %v212_v62  ;;  %v328_v62 = vld [vmem:[#allocation5 + $0x1a8] sm:$0xff] }
  0x3e   :  { %521 = vmatprep.subr.mxu1 %v657_v51 }
  0x3f   :  { %522 = vmatpush3.msra.mxu1 %v211_v63  ;;  %v327_v63 = vld [vmem:[#allocation5 + $0x1a0] sm:$0xff] }
  0x40   :  { %523 = vmatprep.subr.mxu1 %v657_v51 }
  0x41   :  { %524 = vmatpush3.msra.mxu1 %v210_v0  ;;  %v326_v0 = vld [vmem:[#allocation5 + $0x198] sm:$0xff] }
  0x42   :  { %525 = vmatprep.subr.mxu1 %v657_v51 }
  0x43   :  { %526 = vmatpush3.msra.mxu1 %v209_v1  ;;  %v325_v1 = vld [vmem:[#allocation5 + $0x190] sm:$0xff] }
  0x44   :  { %527 = vmatprep.subr.mxu1 %v657_v51 }
  0x45   :  { %528 = vmatpush3.msra.mxu1 %v208_v2  ;;  %v324_v2 = vld [vmem:[#allocation5 + $0x188] sm:$0xff] }
  0x46   :  { %529 = vmatprep.subr.mxu1 %v657_v51 }
  0x47   :  { %530 = vmatpush3.msra.mxu1 %v207_v3  ;;  %v323_v3 = vld [vmem:[#allocation5 + $0x180] sm:$0xff] }
  0x9a   :  { %v65_v43 = vpop.permute.xlu0 %64 }
  0x9b   :  { %v67_v44 = vmul.f32 %v65_v43, %v55_v41 }
  0x9d   :  { %v68_v45 = vadd.f32 %v67_v44, %v60_v42 }
  0x9f   :  { %v50_v46 = vpop.permute.xlu0 %49  ;;  %v69_v47 = vmax.f32 %v68_v45, 0.0 }
  0xa0   :  { %v56_v48 = vmul.f32 %v55_v41, %v50_v46  ;;  %v226_v41 = vrot.slane %v693_v39, %v225_v40  ;;  %v338_v46 = vld [vmem:[#allocation5 + $0x1f8] sm:$0xff] }
  0xa1   :  { %170 = vmatprep.mubr.f32.mxu0 %v69_v47  ;;  %v337_v47 = vld [vmem:[#allocation5 + $0x1f0] sm:$0xff] }
  0xa2   :  { %v61_v49 = vadd.f32 %v60_v42, %v56_v48  ;;  %v336_v48 = vld [vmem:[#allocation5 + $0x1e8] sm:$0xff] }
  0xa4   :  { %v62_v50 = vmax.f32 %v61_v49, 0.0  ;;  %v335_v49 = vld [vmem:[#allocation5 + $0x1e0] sm:$0xff] }
  0xa6   :  { %171 = vmatmul.mubr.f32.vlgmr.msra.gmra.mxu0 %v62_v50  ;;  %v299_v50 = vand.u32 127, %v52_v36  ;;  %v330_v36 = vld [vmem:[#allocation5 + $0x1b8] sm:$0xff] }
  0xa7   :  { %566 = vmatprep.mubr.msk.f32.mxu0 %vm658_vm0, %v657_v51  ;;  %535 = vmatpush3.msra.mxu0 %v338_v46 }
  0xa8   :  { %536 = vmatprep.subr.mxu0 %v657_v51  ;;  %vm303_vm1 = vcmp.lt.s32.totalorder %v299_v50, 32 }
  0xa9   :  { %537 = vmatpush3.msra.mxu0 %v337_v47 }
  0xaa   :  { %538 = vmatprep.subr.mxu0 %v657_v51 }
  0xab   :  { %539 = vmatpush3.msra.mxu0 %v336_v48 }
  0xac   :  { %540 = vmatprep.subr.mxu0 %v657_v51 }
  0xad   :  { %541 = vmatpush3.msra.mxu0 %v335_v49 }
  0xae   :  { %542 = vmatprep.subr.mxu0 %v657_v51 }
  0xaf   :  { %543 = vmatpush3.msra.mxu0 %v334_v57 }
  0xb0   :  { %544 = vmatprep.subr.mxu0 %v657_v51 }
  0xb1   :  { %545 = vmatpush3.msra.mxu0 %v333_v58 }
  0xb2   :  { %546 = vmatprep.subr.mxu0 %v657_v51 }
  0xb3   :  { %547 = vmatpush3.msra.mxu0 %v332_v59 }
  0xb4   :  { %548 = vmatprep.subr.mxu0 %v657_v51 }
  0xb5   :  { %549 = vmatpush3.msra.mxu0 %v331_v60 }
  0xb6   :  { %550 = vmatprep.subr.mxu0 %v657_v51 }
  0xb7   :  { %551 = vmatpush3.msra.mxu0 %v330_v36 }
  0xb8   :  { %552 = vmatprep.subr.mxu0 %v657_v51 }
  0xb9   :  { %553 = vmatpush3.msra.mxu0 %v329_v61 }
  0xba   :  { %554 = vmatprep.subr.mxu0 %v657_v51 }
  0xbb   :  { %555 = vmatpush3.msra.mxu0 %v328_v62 }
  0xbc   :  { %556 = vmatprep.subr.mxu0 %v657_v51 }
  0xbd   :  { %557 = vmatpush3.msra.mxu0 %v327_v63 }
  0xbe   :  { %558 = vmatprep.subr.mxu0 %v657_v51 }
  0xbf   :  { %559 = vmatpush3.msra.mxu0 %v326_v0 }
  0xc0   :  { %560 = vmatprep.subr.mxu0 %v657_v51 }
  0xc1   :  { %561 = vmatpush3.msra.mxu0 %v325_v1 }
  0xc2   :  { %562 = vmatprep.subr.mxu0 %v657_v51 }
  0xc3   :  { %563 = vmatpush3.msra.mxu0 %v324_v2 }
  0xc4   :  { %564 = vmatprep.subr.mxu0 %v657_v51 }
  0xc5   :  { %565 = vmatpush3.msra.mxu0 %v323_v3 }
 0x166   :  { %v462_v5 = vpop.f32.mrf.mxu0 }
 0x168   :  { %v463_v7 = vpop.f32.mrf.mxu0 }
 0x169   :  { %v464_v8 = vadd.f32 %v463_v7, %v462_v5  ;;  %v315_v7 = vsub.s32 6, %v690_v37 }
 0x16b   :  { %v173_v9 = vadd.f32 %v464_v8, %v105_v6  ;;  %v320_v8 = vsub.s32 7, %v690_v37 }
 0x16d   :  { %v176_v10 = vmax.f32 %v173_v9, 0.0  ;;  %v316_v9 = vrot.slane %v693_v39, %v315_v7 }
 0x16f   :  { %v177_v11 = vrot.slane %v176_v10, 4 }
 0x171   :  { %v178_v12 = vadd.f32 %v177_v11, %v176_v10 }
 0x173   :  { %v179_v13 = vrot.slane %v178_v12, 2 }
 0x175   :  { %v180_v14 = vadd.f32 %v179_v13, %v178_v12  ;;  %v321_v12 = vrot.slane %v693_v39, %v320_v8 }
 0x177   :  { %v181_v15 = vrot.slane %v180_v14, 1 }
 0x179   :  { %v182_v16 = vadd.f32 %v181_v15, %v180_v14  ;;  %v46_v15 = vld [vmem:[#allocation2 + $0x8] sm:$0xff] }
 0x17a   :  { %v342_v51 = vrot.slane %v46_v15, %v54_v38 }
 0x17b   :  { %v184_v17 = vmul.f32 0.125, %v182_v16 }
 0x17d   :  { %v185_v18 = vsub.f32 %v176_v10, %v184_v17 }
 0x17f   :  { %v186_v19 = vmul.f32 %v185_v18, %v185_v18 }
 0x181   :  { %v187_v20 = vrot.slane %v186_v19, 4 }
 0x183   :  { %v188_v21 = vadd.f32 %v187_v20, %v186_v19 }
 0x185   :  { %v189_v22 = vrot.slane %v188_v21, 2 }
 0x187   :  { %v190_v23 = vadd.f32 %v189_v22, %v188_v21 }
 0x189   :  { %v191_v24 = vrot.slane %v190_v23, 1 }
 0x18b   :  { %v192_v25 = vadd.f32 %v191_v24, %v190_v23 }
 0x18d   :  { %v193_v26 = vmul.f32 0.125, %v192_v25 }
 0x18f   :  { %v194_v27 = vadd.f32 1e-05, %v193_v26 }
 0x191   :  { %581 = vrsqrt.f32 %v194_v27 }
 0x19e   :  { %v582_v31 = vpop.eup %581 }
 0x19f   :  { %v196_v32 = vmul.f32 %v582_v31, %v185_v18 }
 0x1a1   :  { %v201_v34 = vmul.f32 %v200_v30, %v196_v32 }
 0x1a3   :  { %v206_v35 = vadd.f32 %v205_v33, %v201_v34 }
 0x1a5   :  { %532 = vmatmul.mubr.f32.vlgmr.msra.gmra.mxu1 %v206_v35 }
 0x265   :  { %v293_v42 = vpop.f32.mrf.mxu1 }
 0x266   :  { %v294_v43 = vadd.f32 %v293_v42, %v226_v41 }
 0x267   :  { %v533_v44 = vpop.f32.mrf.mxu1 }
 0x268   :  { %v297_v45 = vmax.f32 %v294_v43, 0.0 }
 0x26a   :  { %300 = vadd.xlane.f32.xlu1 %v297_v45 }
 0x2f3   :  { %v301_v52 = vpop.xlane.xlu1 %300 }
 0x2f4   :  { %v302_v53 = vmul.f32 0.03125, %v301_v52 }
 0x2f6   :  { %v304_v54 = vsub.f32 %v297_v45, %v302_v53 }
 0x2f8   :  { %v305_v55 = vsel %vm303_vm1, %v304_v54, 0.0 }
 0x2f9   :  { %v306_v56 = vmul.f32 %v305_v55, %v305_v55 }
 0x2fb   :  { %307 = vadd.xlane.f32.xlu1 %v306_v56 }
 0x384   :  { %v308_v4 = vpop.xlane.xlu1 %307 }
 0x385   :  { %v309_v5 = vmul.f32 0.03125, %v308_v4 }
 0x387   :  { %v310_v6 = vadd.f32 1e-05, %v309_v5 }
 0x389   :  { %583 = vrsqrt.f32 %v310_v6 }
 0x396   :  { %v584_v10 = vpop.eup %583 }
 0x397   :  { %v312_v11 = vmul.f32 %v584_v10, %v305_v55 }
 0x399   :  { %v317_v13 = vmul.f32 %v316_v9, %v312_v11 }
 0x39b   :  { %v322_v14 = vadd.f32 %v321_v12, %v317_v13 }
 0x39d   :  { %567 = vmatmul.mubr.f32.vlgmr.msra.gmra.mxu0 %v322_v14 }
 0x45d   :  { %v409_v16 = vpop.f32.mrf.mxu0 }
 0x45e   :  { %v410_v17 = vadd.f32 %v409_v16, %v342_v51 }
 0x45f   :  { %v568_v18 = vpop.f32.mrf.mxu0 }
 0x460   :  { %413 = vst [vmem:[#allocation7] sm:$0xff] %v410_v17 }
 0x461   :  { %636 = shalt.err (!%p633_p0)
}
 0x462   :  { %423 = dma.vmem_to_hbm [thread:$0]  %s421_s2, 128, %s755_s3, [#allocation4]  }
 0x463   :  { %649 = dma.done.wait [#allocation4], 128  }
 0x464   :  { %650 = vsyncadd [#allocation4], 4294967168 }
 0x465   :  { %427 = vsyncpa [#allocation3], 1 }
 0x466   :  { %428 = vsyncpa [#allocation6], 1 }
 0x467   :  { %429 = vsyncpa [#allocation4], 1 }

</bundles_post_ra>
